<compile_context>
chip_gen: v7x
topology: tpu7x:2x2x1
jax: 0.10.0
libtpu: 0.0.40
codegen_flags: <defaults>
</compile_context>

<pallas_src>
import functools

import jax
import jax.numpy as jnp
from jax import lax
from jax.experimental import pallas as pl
from jax.experimental.pallas import tpu as pltpu

IGNORE_LABEL = 255


def _make_ce2d_kernel(c, tile_hw, hw, j_inner, ignore_label, needs_mask):
    def kernel(logits_ref, tgt_ref, sum_ref, cnt_ref):
        # logits_ref: (1, C, TILE_HW) native dtype; pixels on the lane axis.
        # tgt_ref:    (1, 1, TILE_HW) narrow int; widened to i32 in-kernel.
        # sum_ref / cnt_ref: (1, 1, 1, 1) f32 partials for this (batch, split),
        # resident across the sequential j axis.
        j = pl.program_id(2)

        @pl.when(j == 0)
        def _():
            sum_ref[...] = jnp.zeros_like(sum_ref)
            cnt_ref[...] = jnp.zeros_like(cnt_ref)

        x = logits_ref[0]                                    # (C, TILE) native
        t = tgt_ref[0].astype(jnp.int32)                     # (1, TILE) i32

        valid = jnp.logical_and(t >= 0, t != ignore_label)   # (1, TILE)
        if needs_mask:
            # Unclamped global tile index: kills both the ragged tail and any
            # dummy (clamped) step introduced by the HW split.
            jg = pl.program_id(1) * j_inner + j
            lane = lax.broadcasted_iota(jnp.int32, (1, tile_hw), 1)
            valid = jnp.logical_and(valid, jg * tile_hw + lane < hw)

        # Class-max in the native dtype (exact; keeps bf16 packed on the VPU),
        # exp / sum / log in f32.  Short-axis (sublane) reductions only.
        m = jnp.max(x, axis=0, keepdims=True).astype(jnp.float32)       # (1,T)
        ex = jnp.exp(x.astype(jnp.float32) - m)                          # (C,T)
        lse = m + jnp.log(jnp.sum(ex, axis=0, keepdims=True))            # (1,T)

        # One-hot compare/select in the native dtype; at most one nonzero per
        # column so the class-sum is exact in any dtype.
        row = lax.broadcasted_iota(jnp.int32, (c, tile_hw), 0)
        sel = jnp.sum(jnp.where(row == t, x, 0), axis=0,
                      keepdims=True).astype(jnp.float32)                 # (1,T)

        # True select: padded/dummy lanes may carry Inf/NaN through lse.
        per_px = jnp.where(valid, lse - sel, 0.0)                        # (1,T)

        sum_ref[...] += jnp.sum(per_px).reshape(1, 1, 1, 1)
        cnt_ref[...] += jnp.sum(valid.astype(jnp.float32)).reshape(1, 1, 1, 1)

    return kernel


def _vmem_budgets():
    """(vmem_limit_bytes, per-step footprint budget) — generation aware."""
    try:
        kind = jax.devices()[0].device_kind.lower()
    except Exception:  # pragma: no cover - defensive
        kind = ""
    if any(g in kind for g in ("v4", "v5", "v6")):
        # 128 MiB physical VMEM: big tiles, generous scoped limit.
        return 96 * 1024 * 1024, 64 * 1024 * 1024
    # v7x (64 MiB physical VMEM) or unknown: stay conservative.
    return 48 * 1024 * 1024, 28 * 1024 * 1024


def _pick_tile_hw(hw, c, logit_itemsize, budget):
    # Honest per-pixel VMEM footprint:
    #   logits double buffer  : 2 * C * itemsize
    #   target double buffer  : 2 * 8 * 4   (conservative: sublane-padded 32b)
    #   f32/i32 in-kernel temps: ~4 * C * 4 (x-m, exp, class iota, one-hot sel)
    bytes_per_px = 2 * c * logit_itemsize + 2 * 8 * 4 + 4 * c * 4
    cap = min(budget // bytes_per_px, 262144)
    cap = max(128, (cap // 128) * 128)
    # If the whole row fits, use the full dim (always a legal block shape).
    return hw if hw <= cap else cap


@functools.partial(jax.jit,
                   static_argnames=("ignore_label", "size_average", "tile_hw"))
def cross_entropy_2d(predict, target, ignore_label=IGNORE_LABEL,
                     size_average=True, tile_hw=None):
    """predict: (N, C, H, W) float, target: (N, H, W) int. Returns scalar loss."""
    n, c, h, w = predict.shape
    assert target.shape == (n, h, w)
    hw = h * w

    # Free reshapes only: no transpose, no pad, no dtype upcast in the wrapper.
    logits = predict.reshape(n, c, hw)
    if target.dtype in (jnp.int16, jnp.int32):
        tgt = target.reshape(n, 1, hw)            # narrow pass-through
    else:
        tgt = target.reshape(n, 1, hw).astype(jnp.int32)

    vmem_limit, vmem_budget = _vmem_budgets()
    if tile_hw is None:
        tile_hw = _pick_tile_hw(hw, c, jnp.dtype(predict.dtype).itemsize,
                                vmem_budget)
    else:
        tile_hw = min(int(tile_hw), hw)
        assert tile_hw == hw or tile_hw % 128 == 0, \
            "tile_hw must be a multiple of 128 (or >= H*W)"

    num_j = pl.cdiv(hw, tile_hw)
    # Megacore: batch axis is parallel; if N==1, split the HW-tile range into
    # two parallel halves so v7x's second TensorCore still gets work.
    splits = 2 if (n == 1 and num_j >= 2) else 1
    j_inner = pl.cdiv(num_j, splits)
    overshoot = splits * j_inner != num_j
    needs_mask = (hw % tile_hw != 0) or overshoot

    kernel = _make_ce2d_kernel(c, tile_hw, hw, j_inner, ignore_label, needs_mask)

    if overshoot:
        # Clamp the block index for the (masked) dummy step of the short split.
        def data_map(i, s, j):
            return (i, 0, jnp.minimum(s * j_inner + j, num_j - 1))
    else:
        def data_map(i, s, j):
            return (i, 0, s * j_inner + j)

    out_map = lambda i, s, j: (i, s, 0, 0)

    sums, cnts = pl.pallas_call(
        kernel,
        out_shape=(jax.ShapeDtypeStruct((n, splits, 1, 1), jnp.float32),
                   jax.ShapeDtypeStruct((n, splits, 1, 1), jnp.float32)),
        grid_spec=pltpu.PrefetchScalarGridSpec(
            num_scalar_prefetch=0,
            grid=(n, splits, j_inner),
            in_specs=[
                pl.BlockSpec((1, c, tile_hw), data_map),
                pl.BlockSpec((1, 1, tile_hw), data_map),
            ],
            out_specs=[
                pl.BlockSpec((1, 1, 1, 1), out_map),
                pl.BlockSpec((1, 1, 1, 1), out_map),
            ],
        ),
        compiler_params=pltpu.CompilerParams(
            dimension_semantics=("parallel", "parallel", "arbitrary"),
            vmem_limit_bytes=vmem_limit),
    )(logits, tgt)

    s = jnp.sum(sums)
    cnt = jnp.sum(cnts)
    # size_average=True -> mean over valid pixels; if no valid pixels the
    # PyTorch module returns zeros(1), so return 0.
    if size_average:
        return jnp.where(cnt > 0, s / jnp.maximum(cnt, 1.0), 0.0)
    return s


def _reference(predict, target, ignore_label=IGNORE_LABEL):
    """Pure-JAX reference for sanity check."""
    n, c, h, w = predict.shape
    logits = jnp.transpose(predict, (0, 2, 3, 1)).reshape(-1, c).astype(jnp.float32)
    t = target.reshape(-1).astype(jnp.int32)
    valid = (t >= 0) & (t != ignore_label)
    lse = jax.scipy.special.logsumexp(logits, axis=-1)
    sel = jnp.take_along_axis(logits, jnp.clip(t, 0, c - 1)[:, None], axis=-1)[:, 0]
    per = jnp.where(valid, lse - sel, 0.0)
    cnt = jnp.sum(valid)
    return jnp.where(cnt > 0, jnp.sum(per) / jnp.maximum(cnt, 1), 0.0)


if __name__ == "__main__":
    key = jax.random.PRNGKey(0)

    def run_case(name, n, c, h, w, pdtype, tdtype, tile_hw=None, salt=0):
        k1, k2, k3 = jax.random.split(jax.random.fold_in(key, salt), 3)
        predict = jax.random.normal(k1, (n, c, h, w), dtype=jnp.float32).astype(pdtype)
        target = jax.random.randint(k2, (n, h, w), 0, c, dtype=jnp.int32)
        ignore_mask = jax.random.uniform(k3, (n, h, w)) < 0.2
        target = jnp.where(ignore_mask, IGNORE_LABEL, target).astype(tdtype)
        loss = cross_entropy_2d(predict, target, tile_hw=tile_hw)
        jax.block_until_ready(loss)
        ref = _reference(predict, target)
        assert jnp.allclose(loss, ref, atol=1e-5, rtol=1e-5), (name, loss, ref)

    # Primary spec-consistent small case: batch-parallel path, single HW tile.
    run_case("base", 2, 4, 16, 16, jnp.float32, jnp.int32)
    # N==1 HW-split parallel path, multi-tile accumulation, int16 targets.
    run_case("split_exact", 1, 4, 16, 32, jnp.float32, jnp.int16, tile_hw=128, salt=1)
    # Ragged tail + dummy (clamped) step + bf16 native-dtype max/select path.
    run_case("split_tail_bf16", 1, 4, 16, 18, jnp.bfloat16, jnp.int32, tile_hw=128, salt=2)

    # All pixels ignored -> loss must be exactly 0 (PyTorch returns zeros(1)).
    pz = jax.random.normal(key, (2, 4, 16, 16), dtype=jnp.float32)
    all_ign = jnp.full((2, 16, 16), IGNORE_LABEL, dtype=jnp.int32)
    lz = cross_entropy_2d(pz, all_ign)
    jax.block_until_ready(lz)
    assert jnp.allclose(lz, 0.0), lz

    print("KERNEL_OK")
</pallas_src>

<mosaic_0001>
module attributes {stable_mosaic.version = 11 : i64} {
  func.func @kernel(%arg0: i32, %arg1: i32, %arg2: i32, %arg3: memref<1x4x256xf32, #tpu.memory_space<vmem>>, %arg4: memref<1x1x256xi32, #tpu.memory_space<vmem>>, %arg5: memref<1x1x1x1xf32, #tpu.memory_space<vmem>>, %arg6: memref<1x1x1x1xf32, #tpu.memory_space<vmem>>) attributes {dimension_semantics = [#tpu.dimension_semantics<parallel>, #tpu.dimension_semantics<parallel>, #tpu.dimension_semantics<arbitrary>], iteration_bounds = array<i64: 2, 1, 1>, scalar_prefetch = 0 : i64, scratch_operands = 0 : i64, tpu.core_type = #tpu.core_type<tc>, window_params = [{transform_indices = @transform_0, window_bounds = array<i64: 1, 4, 256>}, {transform_indices = @transform_1, window_bounds = array<i64: 1, 1, 256>}, {transform_indices = @transform_2, window_bounds = array<i64: 1, 1, 1, 1>}, {transform_indices = @transform_3, window_bounds = array<i64: 1, 1, 1, 1>}]} {
    %c0_i32 = arith.constant 0 : i32
    %0 = arith.cmpi eq, %arg2, %c0_i32 : i32
    %1 = arith.extui %0 : i1 to i32
    %c0_i32_0 = arith.constant 0 : i32
    %2 = arith.cmpi ne, %1, %c0_i32_0 : i32
    scf.if %2 {
      %cst_29 = arith.constant 0.000000e+00 : f32
      %50 = vector.broadcast %cst_29 : f32 to vector<1x1x1x1xf32>
      %c0_30 = arith.constant 0 : index
      %c0_31 = arith.constant 0 : index
      %c0_32 = arith.constant 0 : index
      %c0_33 = arith.constant 0 : index
      %51 = vector.load %arg5[%c0_30, %c0_31, %c0_32, %c0_33] : memref<1x1x1x1xf32, #tpu.memory_space<vmem>>, vector<1x1x1x1xf32>
      tpu.vector_store %arg5[%c0_30, %c0_31, %c0_32, %c0_33], %50 {strides = array<i32>} : memref<1x1x1x1xf32, #tpu.memory_space<vmem>>, vector<1x1x1x1xf32>,
      %cst_34 = arith.constant 0.000000e+00 : f32
      %52 = vector.broadcast %cst_34 : f32 to vector<1x1x1x1xf32>
      %c0_35 = arith.constant 0 : index
      %c0_36 = arith.constant 0 : index
      %c0_37 = arith.constant 0 : index
      %c0_38 = arith.constant 0 : index
      %53 = vector.load %arg6[%c0_35, %c0_36, %c0_37, %c0_38] : memref<1x1x1x1xf32, #tpu.memory_space<vmem>>, vector<1x1x1x1xf32>
      tpu.vector_store %arg6[%c0_35, %c0_36, %c0_37, %c0_38], %52 {strides = array<i32>} : memref<1x1x1x1xf32, #tpu.memory_space<vmem>>, vector<1x1x1x1xf32>,
    } else {
    }
    %c0 = arith.constant 0 : index
    %c0_1 = arith.constant 0 : index
    %c0_2 = arith.constant 0 : index
    %3 = vector.load %arg3[%c0, %c0_1, %c0_2] : memref<1x4x256xf32, #tpu.memory_space<vmem>>, vector<1x4x256xf32>
    %4 = vector.shape_cast %3 : vector<1x4x256xf32> to vector<4x256xf32>
    %c0_3 = arith.constant 0 : index
    %c0_4 = arith.constant 0 : index
    %c0_5 = arith.constant 0 : index
    %5 = vector.load %arg4[%c0_3, %c0_4, %c0_5] : memref<1x1x256xi32, #tpu.memory_space<vmem>>, vector<1x1x256xi32>
    %6 = vector.shape_cast %5 : vector<1x1x256xi32> to vector<1x256xi32>
    %c0_i32_6 = arith.constant 0 : i32
    %7 = vector.broadcast %c0_i32_6 : i32 to vector<1x256xi32>
    %8 = arith.cmpi sge, %6, %7 : vector<1x256xi32>
    %c255_i32 = arith.constant 255 : i32
    %9 = vector.broadcast %c255_i32 : i32 to vector<1x256xi32>
    %10 = arith.cmpi ne, %6, %9 : vector<1x256xi32>
    %11 = arith.andi %8, %10 : vector<1x256xi1>
    %cst = arith.constant dense<0xFF800000> : vector<256xf32>
    %12 = vector.multi_reduction <maximumf>, %4, %cst [0] : vector<4x256xf32> to vector<256xf32>
    %13 = vector.shape_cast %12 : vector<256xf32> to vector<1x256xf32>
    %14 = vector.broadcast %13 : vector<1x256xf32> to vector<4x256xf32>
    %15 = arith.subf %4, %14 : vector<4x256xf32>
    %16 = math.exp %15 : vector<4x256xf32>
    %cst_7 = arith.constant dense<0.000000e+00> : vector<256xf32>
    %17 = vector.multi_reduction <add>, %16, %cst_7 [0] : vector<4x256xf32> to vector<256xf32>
    %18 = vector.shape_cast %17 : vector<256xf32> to vector<1x256xf32>
    %19 = math.log %18 : vector<1x256xf32>
    %20 = arith.addf %13, %19 : vector<1x256xf32>
    %21 = tpu.iota {dimensions = array<i32: 0>} : vector<4x256xi32>
    %22 = vector.broadcast %6 : vector<1x256xi32> to vector<4x256xi32>
    %23 = arith.cmpi eq, %21, %22 : vector<4x256xi32>
    %c0_i32_8 = arith.constant 0 : i32
    %24 = arith.sitofp %c0_i32_8 : i32 to f32
    %25 = vector.broadcast %24 : f32 to vector<4x256xf32>
    %26 = arith.select %23, %4, %25 : vector<4x256xi1>, vector<4x256xf32>
    %cst_9 = arith.constant dense<0.000000e+00> : vector<256xf32>
    %27 = vector.multi_reduction <add>, %26, %cst_9 [0] : vector<4x256xf32> to vector<256xf32>
    %28 = vector.shape_cast %27 : vector<256xf32> to vector<1x256xf32>
    %29 = arith.subf %20, %28 : vector<1x256xf32>
    %cst_10 = arith.constant 0.000000e+00 : f32
    %30 = vector.broadcast %cst_10 : f32 to vector<1x256xf32>
    %31 = arith.select %11, %29, %30 : vector<1x256xi1>, vector<1x256xf32>
    %c0_11 = arith.constant 0 : index
    %c0_12 = arith.constant 0 : index
    %c0_13 = arith.constant 0 : index
    %c0_14 = arith.constant 0 : index
    %32 = vector.load %arg5[%c0_11, %c0_12, %c0_13, %c0_14] : memref<1x1x1x1xf32, #tpu.memory_space<vmem>>, vector<1x1x1x1xf32>
    %33 = vector.shape_cast %31 : vector<1x256xf32> to vector<1x1x256xf32>
    %cst_15 = arith.constant dense<0.000000e+00> : vector<1xf32>
    %34 = vector.multi_reduction <add>, %33, %cst_15 [1, 2] : vector<1x1x256xf32> to vector<1xf32>
    %35 = vector.shape_cast %34 : vector<1xf32> to vector<1x1x1xf32>
    %36 = vector.extract %35[0, 0, 0] : f32 from vector<1x1x1xf32>
    %37 = vector.broadcast %36 : f32 to vector<1x1x1x1xf32>
    %38 = arith.addf %32, %37 : vector<1x1x1x1xf32>
    %c0_16 = arith.constant 0 : index
    %c0_17 = arith.constant 0 : index
    %c0_18 = arith.constant 0 : index
    %c0_19 = arith.constant 0 : index
    %39 = vector.load %arg5[%c0_16, %c0_17, %c0_18, %c0_19] : memref<1x1x1x1xf32, #tpu.memory_space<vmem>>, vector<1x1x1x1xf32>
    tpu.vector_store %arg5[%c0_16, %c0_17, %c0_18, %c0_19], %38 {strides = array<i32>} : memref<1x1x1x1xf32, #tpu.memory_space<vmem>>, vector<1x1x1x1xf32>,
    %c0_20 = arith.constant 0 : index
    %c0_21 = arith.constant 0 : index
    %c0_22 = arith.constant 0 : index
    %c0_23 = arith.constant 0 : index
    %40 = vector.load %arg6[%c0_20, %c0_21, %c0_22, %c0_23] : memref<1x1x1x1xf32, #tpu.memory_space<vmem>>, vector<1x1x1x1xf32>
    %41 = arith.extui %11 : vector<1x256xi1> to vector<1x256xi32>
    %42 = arith.sitofp %41 : vector<1x256xi32> to vector<1x256xf32>
    %43 = vector.shape_cast %42 : vector<1x256xf32> to vector<1x1x256xf32>
    %cst_24 = arith.constant dense<0.000000e+00> : vector<1xf32>
    %44 = vector.multi_reduction <add>, %43, %cst_24 [1, 2] : vector<1x1x256xf32> to vector<1xf32>
    %45 = vector.shape_cast %44 : vector<1xf32> to vector<1x1x1xf32>
    %46 = vector.extract %45[0, 0, 0] : f32 from vector<1x1x1xf32>
    %47 = vector.broadcast %46 : f32 to vector<1x1x1x1xf32>
    %48 = arith.addf %40, %47 : vector<1x1x1x1xf32>
    %c0_25 = arith.constant 0 : index
    %c0_26 = arith.constant 0 : index
    %c0_27 = arith.constant 0 : index
    %c0_28 = arith.constant 0 : index
    %49 = vector.load %arg6[%c0_25, %c0_26, %c0_27, %c0_28] : memref<1x1x1x1xf32, #tpu.memory_space<vmem>>, vector<1x1x1x1xf32>
    tpu.vector_store %arg6[%c0_25, %c0_26, %c0_27, %c0_28], %48 {strides = array<i32>} : memref<1x1x1x1xf32, #tpu.memory_space<vmem>>, vector<1x1x1x1xf32>,
    return
  }
  func.func @transform_0(%arg0: i32, %arg1: i32, %arg2: i32) -> (i32, i32, i32) {
    %c1_i32 = arith.constant 1 : i32
    %0 = arith.muli %arg1, %c1_i32 : i32
    %1 = arith.addi %0, %arg2 : i32
    %c0_i32 = arith.constant 0 : i32
    %c0_i32_0 = arith.constant 0 : i32
    return %arg0, %c0_i32, %1 : i32, i32, i32
  }
  func.func @transform_1(%arg0: i32, %arg1: i32, %arg2: i32) -> (i32, i32, i32) {
    %c1_i32 = arith.constant 1 : i32
    %0 = arith.muli %arg1, %c1_i32 : i32
    %1 = arith.addi %0, %arg2 : i32
    %c0_i32 = arith.constant 0 : i32
    %c0_i32_0 = arith.constant 0 : i32
    return %arg0, %c0_i32, %1 : i32, i32, i32
  }
  func.func @transform_2(%arg0: i32, %arg1: i32, %arg2: i32) -> (i32, i32, i32, i32) {
    %c0_i32 = arith.constant 0 : i32
    %c0_i32_0 = arith.constant 0 : i32
    %c0_i32_1 = arith.constant 0 : i32
    return %arg0, %arg1, %c0_i32, %c0_i32_0 : i32, i32, i32, i32
  }
  func.func @transform_3(%arg0: i32, %arg1: i32, %arg2: i32) -> (i32, i32, i32, i32) {
    %c0_i32 = arith.constant 0 : i32
    %c0_i32_0 = arith.constant 0 : i32
    %c0_i32_1 = arith.constant 0 : i32
    return %arg0, %arg1, %c0_i32, %c0_i32_0 : i32, i32, i32, i32
  }
}

</mosaic_0001>

<bundles_post_ra>
// kernel: cross_entropy_2d.1
= control target key start
LH: loop header
LB: loop body
LE: loop exit
PB: predicated region body
PF: predicated region fallthrough
CT: control target
= control target key end

     0   :  { %s660_s12 = smov 0   ;;  %s662_s13 = smov 0   ;;  %s725_s0 = inlined_call_operand.vmem [shape: f32[2,4,256], index: 0, kind: input, shape index: {}]   ;;  %s726_s1 = inlined_call_operand.vmem [shape: s32[2,1,256], index: 1, kind: input, shape index: {}]   ;;  %s727_s2 = inlined_call_operand.vmem [shape: f32[2,1,1,1], index: 2, kind: output, shape index: {0}]   ;;  %s728_s3 = inlined_call_operand.vmem [shape: f32[2,1,1,1], index: 3, kind: output, shape index: {1}]  }
   0x1   :  { %s664_s14 = smov 0  }
   0x2 LB: > { %s33_s15 = sadd.s32 1, %s632_s13  ;;  %p569_p0 = scmp.ge.s32.totalorder %s636_s14, 1  ;;  %s636_s14 = sphi %s664_s14, %s14_s14   ;;  %s632_s13 = sphi %s662_s13, %s730_s13   ;;  %s628_s12 = sphi %s660_s12, %s729_s12  }
   0x3   : > { %p35_p1 = scmp.ge.s32.totalorder %s33_s15, 2  ;;  %p194_p2 = scmp.lt.s32.totalorder %s636_s14, 3 }
   0x5   : > { %s732_s15 = smov (%p35_p1, %s33_s15), 0  ;;  %p195_p3 = pnand %p569_p0, %p194_p2 }
   0x6   : > { %p241_p4 = scmp.lt.s32.totalorder (!%p195_p3), %s628_s12, 1  ;;  %vm289_vm0 = vcmask (!%p195_p3), 1043456   ;;  %v334_v15 = vlaneseq (!%p195_p3)  ;;  %v638_v56 = vmov (!%p195_p3), 1966171168   ;;  %vm395_vm6 = vcmask (!%p195_p3), 1040384  }
   0x7   : > { %198 = sbr.rel (%p195_p3) target bundleno = 306 (0x132), region = 28  ;;  %v368_v57 = vunpack.c.l.s4 (!%p195_p3), %v638_v56  ;;  %vm278_vm7 = vcmask (!%p195_p3), 0  }
   0x8   : > { %v335_v18 = vshrl.u32 (!%p195_p3), %v334_v15, 7 }
   0xa   : > { %v690_v21 = vsub.s32 (!%p195_p3), 0, %v335_v18  ;;  %v692_v23 = vsub.s32 (!%p195_p3), 1, %v335_v18 }
   0xe   : > { %s734_s12 = smov (!%p241_p4, %s628_s12), 1 }
   0xf   : > { %s576_s16 = sshll.u32 %s734_s12, 3  ;;  %s572_s20 = sshll.u32 %s734_s12, 1 }
  0x10   : > { %s248_s19 = scalar_lea.vmem %s725_s0, %s576_s16  ;;  %s259_s23 = scalar_lea.vmem %s726_s1, %s572_s20 }
  0x11   : > { %v281_v0 = vld [vmem:[%s248_s19] sm:$0xff]  ;;  %s267_s26 = scalar_lea.vmem %s727_s2, %s734_s12  ;;  %s273_s29 = scalar_lea.vmem %s728_s3, %s734_s12 }
  0x12   : > { %v287_v1 = vcombine.high %v281_v0, %v281_v0  ;;  %v290_v2 = vsel %vm289_vm0, %v281_v0, -inf  ;;  %v282_v22 = vld [vmem:[%s259_s23] sm:$0x3] }
  0x13   : > { %v291_v3 = vrot.slane %v290_v2, 4  ;;  %v339_v24 = vrot.slane %v282_v22, %v690_v21  ;;  %v343_v25 = vrot.slane %v282_v22, %v692_v23  ;;  %vm283_vm3 = vcmp.ge.s32.totalorder %v282_v22, 0 }
  0x14   : > { %v297_v4 = vsel %vm289_vm0, %v287_v1, -inf  ;;  %vm284_vm4 = vcmp.ne.s32.totalorder %v282_v22, 255 }
  0x15   : > { %v292_v5 = vmax.f32 %v290_v2, %v291_v3  ;;  %v298_v6 = vrot.slane %v297_v4, 4  ;;  %vm344_vm1 = vcmp.eq.s32.totalorder %v335_v18, %v339_v24  ;;  %vm345_vm2 = vcmp.eq.s32.totalorder %v335_v18, %v343_v25  ;;  %vm285_vm5 = vmand %vm283_vm3, %vm284_vm4 }
  0x16   : > { %v346_v26 = vsel %vm344_vm1, %v281_v0, 0.0  ;;  %v347_v30 = vsel %vm345_vm2, %v287_v1, 0.0  ;;  %v369_v1 = vunpack.c.0.s8 %v368_v57 }
  0x17   : > { %v293_v7 = vrot.slane %v292_v5, 2  ;;  %v299_v8 = vmax.f32 %v297_v4, %v298_v6  ;;  %v348_v32 = vsel %vm289_vm0, %v346_v26, 0.0  ;;  %v355_v36 = vsel %vm289_vm0, %v347_v30, 0.0 }
  0x18   : > { %v349_v37 = vrot.slane %v348_v32, 4  ;;  %v356_v40 = vrot.slane %v355_v36, 4 }
  0x19   : > { %v294_v9 = vmax.f32 %v292_v5, %v293_v7  ;;  %v300_v10 = vrot.slane %v299_v8, 2  ;;  %v372_v5 = vsub.s32 %v369_v1, %v335_v18 }
  0x1a   : > { %v350_v43 = vadd.f32 %v349_v37, %v348_v32  ;;  %v357_v46 = vadd.f32 %v356_v40, %v355_v36 }
  0x1b   : > { %v295_v11 = vrot.slane %v294_v9, 1  ;;  %v301_v12 = vmax.f32 %v299_v8, %v300_v10  ;;  %v639_v8 = vmov 0.0  }
  0x1c   : > { %v351_v49 = vrot.slane %v350_v43, 2  ;;  %v358_v51 = vrot.slane %v357_v46, 2  ;;  %279 = vst.msk [vmem:[%s267_s26] sm:$0x1] %vm278_vm7, %v639_v8  ;;  %280 = vst.msk [vmem:[%s273_s29] sm:$0x1] %vm278_vm7, %v639_v8 }
  0x1d   : > { %v296_v13 = vmax.f32 %v294_v9, %v295_v11  ;;  %v302_v14 = vrot.slane %v301_v12, 1  ;;  %v573_v9 = vsel %vm285_vm5, 1.0, %v639_v8 }
  0x1e   : > { %v352_v52 = vadd.f32 %v351_v49, %v350_v43  ;;  %v359_v53 = vadd.f32 %v358_v51, %v357_v46  ;;  %v419_v11 = vrot.slane %v573_v9, %v690_v21 }
  0x1f   : > { %v303_v16 = vmax.f32 %v301_v12, %v302_v14  ;;  %v423_v12 = vrot.slane %v573_v9, %v692_v23 }
  0x20   : > { %v353_v54 = vrot.slane %v352_v52, 1  ;;  %v360_v55 = vrot.slane %v359_v53, 1  ;;  %v426_v18 = vsel %vm395_vm6, %v419_v11, 0.0 }
  0x21   : > { %v306_v17 = vcombine.low %v296_v13, %v303_v16 }
  0x22   : > { %v354_v60 = vadd.f32 %v353_v54, %v352_v52 }
  0x23   : > { %v308_v19 = vsub.f32 %v281_v0, %v306_v17  ;;  %v361_v0 = vadd.f32 %v360_v55, %v359_v53  ;;  %v383_v36 = vld [vmem:[%s267_s26] sm:$0x1] }
  0x25   : > { %v309_v20 = vmul.f32 1.442695, %v308_v19  ;;  %v427_v19 = vsel %vm395_vm6, %v423_v12, 0.0 }
  0x26   : > { %v428_v22 = vadd.f32 %v427_v19, %v426_v18 }
  0x27   : > { %608 = vpow2.f32 %v309_v20 }
  0x31   : > { %v609_v27 = vpop.eup %608 }
  0x32   : > { %v312_v28 = vcombine.high %v609_v27, %v609_v27  ;;  %v314_v29 = vsel %vm289_vm0, %v609_v27, 0.0 }
  0x33   : > { %v315_v31 = vrot.slane %v314_v29, 4 }
  0x34   : > { %v321_v33 = vsel %vm289_vm0, %v312_v28, 0.0 }
  0x35   : > { %v316_v34 = vadd.f32 %v315_v31, %v314_v29  ;;  %v322_v35 = vrot.slane %v321_v33, 4 }
  0x37   : > { %v317_v38 = vrot.slane %v316_v34, 2  ;;  %v323_v39 = vadd.f32 %v322_v35, %v321_v33 }
  0x39   : > { %v318_v41 = vadd.f32 %v317_v38, %v316_v34  ;;  %v324_v42 = vrot.slane %v323_v39, 2 }
  0x3b   : > { %v319_v44 = vrot.slane %v318_v41, 1  ;;  %v325_v45 = vadd.f32 %v324_v42, %v323_v39  ;;  %v412_v39 = vld [vmem:[%s273_s29] sm:$0x1] }
  0x3d   : > { %v320_v47 = vadd.f32 %v319_v44, %v318_v41  ;;  %v326_v48 = vrot.slane %v325_v45, 1 }
  0x3f   : > { %v327_v50 = vadd.f32 %v326_v48, %v325_v45  ;;  %610 = vlog2.f32 %v320_v47 }
  0x41   : > { %612 = vlog2.f32 %v327_v50 }
  0x49   : > { %v611_v58 = vpop.eup %610 }
  0x4a   : > { %v329_v59 = vmul.f32 0.6931472, %v611_v58 }
  0x4b   : > { %v613_v61 = vpop.eup %612 }
  0x4c   : > { %v331_v62 = vmul.f32 0.6931472, %v613_v61  ;;  %v332_v63 = vadd.f32 %v329_v59, %v296_v13 }
  0x4e   : > { %v333_v2 = vadd.f32 %v331_v62, %v303_v16  ;;  %v362_v3 = vsub.f32 %v332_v63, %v354_v60 }
  0x50   : > { %v363_v4 = vsub.f32 %v333_v2, %v361_v0 }
  0x52   : > { %v366_v6 = vcombine.low %v362_v3, %v363_v4 }
  0x54   : > { %v373_v7 = vrot.slane %v366_v6, %v372_v5 }
  0x56   : > { %v380_v10 = vrot.slane %v373_v7, %v372_v5 }
  0x58   : > { %v382_v13 = vsel %vm285_vm5, %v380_v10, 0.0 }
  0x59   : > { %v388_v14 = vrot.slane %v382_v13, %v690_v21  ;;  %v392_v15 = vrot.slane %v382_v13, %v692_v23 }
  0x5b   : > { %v396_v16 = vsel %vm395_vm6, %v388_v14, 0.0  ;;  %v397_v17 = vsel %vm395_vm6, %v392_v15, 0.0 }
  0x5c   : > { %v398_v20 = vadd.f32 %v397_v17, %v396_v16 }
  0x5e   : > { %399 = vadd.xlane.f32.xlu0 %v398_v20 }
  0x62   : > { %429 = vadd.xlane.f32.xlu0 %v428_v22 }
  0xeb   : > { %v400_v21 = vpop.xlane.xlu0 %399 }
  0xec   : > { %v401_v23 = vrot.slane %v400_v21, 4 }
  0xee   : > { %v402_v24 = vadd.f32 %v401_v23, %v400_v21 }
  0xef   : > { %v430_v25 = vpop.xlane.xlu0 %429 }
  0xf0   : > { %v403_v26 = vrot.slane %v402_v24, 2  ;;  %v431_v27 = vrot.slane %v430_v25, 4 }
  0xf2   : > { %v432_v28 = vadd.f32 %v431_v27, %v430_v25  ;;  %v404_v29 = vadd.f32 %v403_v26, %v402_v24 }
  0xf4   : > { %v433_v30 = vrot.slane %v432_v28, 2  ;;  %v405_v31 = vrot.slane %v404_v29, 1 }
  0xf6   : > { %v434_v32 = vadd.f32 %v433_v30, %v432_v28  ;;  %v406_v33 = vadd.f32 %v405_v31, %v404_v29 }
  0xf8   : > { %577 = vpush %v406_v33  ;;  %v435_v34 = vrot.slane %v434_v32, 1 }
  0xfa   : > { %v436_v35 = vadd.f32 %v435_v34, %v434_v32 }
  0xfc   : > { %579 = vpush %v436_v35 }
 0x129   : > { %s578_s30 = spop %577 }
 0x12a   : > { %v408_v37 = vstv %s578_s30 }
 0x12b   : > { %v409_v38 = vadd.f32 %v408_v37, %v383_v36 }
 0x12d   : > { %411 = vst.msk [vmem:[%s267_s26] sm:$0x1] %vm278_vm7, %v409_v38  ;;  %s580_s4 = spop %579 }
 0x12e   : > { %v438_v40 = vstv %s580_s4 }
 0x12f   : > { %v439_v41 = vadd.f32 %v438_v40, %v412_v39 }
 0x131   : > { %440 = vst.msk [vmem:[%s273_s29] sm:$0x1] %vm278_vm7, %v439_v41 }
 0x132 PF: > { %s14_s14 = sadd.s32 1, %s636_s14   ;;  %s729_s12 = smov %s632_s13 }
 0x133   : > { %p11_p5 = scmp.ge.s32.totalorder %s14_s14, 4   ;;  %s730_s13 = smov %s732_s15 }
 0x135   :  { %13 = sbr.rel (!%p11_p5) target bundleno = 2 (0x2), region = 77 }

</bundles_post_ra>
